<compile_context>
chip_gen: v6e
topology: v6e:2x2x1
jax: 0.10.0
libtpu: 0.0.40
codegen_flags: <defaults>
</compile_context>

<pallas_src>
import functools

import jax
import jax.numpy as jnp
from jax.experimental import pallas as pl
from jax.experimental.pallas import tpu as pltpu


def _round_up(x, m):
    return ((x + m - 1) // m) * m


# ----------------------------------------------------------------------------
# Kernel
# ----------------------------------------------------------------------------
def _attn_gated_kernel(x_ref, wab_ref, bab_ref, wc_ref, bc_ref, out_ref, *, Dp):
    # Fused attention_a / attention_b projection: (tile, L) @ (L, 2*Dp).
    # Operands keep the compute dtype (bf16 -> full MXU rate); accumulate f32.
    ab = (
        jnp.dot(x_ref[...], wab_ref[...], preferred_element_type=jnp.float32)
        + bab_ref[...]
    )
    # Dp is a multiple of 128, so both halves are sliced at a lane boundary.
    a = jnp.tanh(ab[:, :Dp])
    # sigmoid(z) == 0.5 * (tanh(z/2) + 1): one EUP push instead of exp + recip.
    b = 0.5 * (jnp.tanh(0.5 * ab[:, Dp:]) + 1.0)
    gated = (a * b).astype(wc_ref.dtype)

    # attention_c: (tile, Dp) @ (Dp, nc_pad); nc_pad is lane-dense (>=128),
    # so the output store is an unmasked vst.
    A = (
        jnp.dot(gated, wc_ref[...], preferred_element_type=jnp.float32)
        + bc_ref[...]
    )
    out_ref[...] = A.astype(out_ref.dtype)


# ----------------------------------------------------------------------------
# One-time parameter preprocessing (hoisted out of the hot forward path)
# ----------------------------------------------------------------------------
def prepare_params(params, compute_dtype=jnp.bfloat16):
    """Fuse / pad / cast weights once.

    * fuses Wa|Wb into a single (L, 2*Dp) weight -> one x@W matmul per tile,
    * pads D up to a multiple of 128 (lane-boundary slices in the kernel),
    * pads n_classes up to 128 (lane-dense, unmasked output stores),
    * casts matmul weights to the compute dtype (bf16 default); biases stay
      f32 because they are added onto the f32 accumulator.
    """
    wa, ba, wb, bb, wc, bc = (
        params["wa"], params["ba"], params["wb"], params["bb"],
        params["wc"], params["bc"],
    )
    L, D = wa.shape
    n_classes = wc.shape[1]
    Dp = _round_up(D, 128)
    nc_pad = _round_up(max(n_classes, 1), 128)

    def pad_cols(w, new_cols):
        return jnp.pad(w, ((0, 0), (0, new_cols - w.shape[1])))

    wa_p, wb_p = pad_cols(wa, Dp), pad_cols(wb, Dp)
    ba_p, bb_p = pad_cols(ba, Dp), pad_cols(bb, Dp)
    wc_p = jnp.pad(wc, ((0, Dp - D), (0, nc_pad - n_classes)))
    bc_p = pad_cols(bc, nc_pad)

    return {
        "wab": jnp.concatenate([wa_p, wb_p], axis=1).astype(compute_dtype),
        "bab": jnp.concatenate([ba_p, bb_p], axis=1).astype(jnp.float32),
        "wc": wc_p.astype(compute_dtype),
        "bc": bc_p.astype(jnp.float32),
        "L": L, "D": D, "Dp": Dp,
        "n_classes": n_classes, "nc_pad": nc_pad,
        "compute_dtype": jnp.dtype(compute_dtype),
    }


def _vmem_limit_bytes(tile, L, Dp, nc_pad, *, cbytes, obytes, x_buffers):
    """Actual VMEM need (+~30% headroom), capped well under v7x's 64 MiB."""
    x_buf = tile * L * cbytes * max(2, x_buffers)
    w_buf = (L * 2 * Dp + Dp * nc_pad) * cbytes * 2          # double-buffered
    b_buf = (2 * Dp + nc_pad) * 4 * 2
    out_buf = tile * nc_pad * obytes * 2
    # f32 intermediates inside the kernel body (ab, a, b, gated, A).
    interm = tile * (2 * Dp * 4 + 2 * Dp * 4 + Dp * cbytes + nc_pad * 4)
    need = x_buf + w_buf + b_buf + out_buf + interm
    return int(max(16 << 20, min(48 << 20, int(need * 1.3) + (2 << 20))))


# ----------------------------------------------------------------------------
# Forward
# ----------------------------------------------------------------------------
def attn_net_gated_forward(x, prepared, *, tile_n=1024, x_buffers=2):
    """Pallas forward of Attn_Net_Gated.  x: (N, L).  Returns (A, x)."""
    N, L = x.shape
    assert L == prepared["L"], (L, prepared["L"])
    Dp = prepared["Dp"]
    nc_pad = prepared["nc_pad"]
    n_classes = prepared["n_classes"]
    cdt = prepared["compute_dtype"]

    # Feed the MXU its native dtype (bf16 by default).  No-op if x already is.
    x_c = x if x.dtype == cdt else x.astype(cdt)

    # Row tile: multiple of 16 (bf16-legal sublane count), capped so the row
    # grid always has >= 2 steps -> megacore / both v7x TensorCores get work.
    tile = max(16, min(int(tile_n), _round_up(pl.cdiv(N, 2), 16)))
    grid = (pl.cdiv(N, tile),)   # no x padding; partial last block is
                                 # boundary-handled (row-wise math -> safe).

    out_dtype = x.dtype
    vmem_limit = _vmem_limit_bytes(
        tile, L, Dp, nc_pad,
        cbytes=jnp.dtype(cdt).itemsize,
        obytes=jnp.dtype(out_dtype).itemsize,
        x_buffers=x_buffers,
    )

    x_spec_kwargs = {}
    if x_buffers != 2:
        # Deeper input pipelining (use if a profile shows exposed x DMA).
        x_spec_kwargs["pipeline_mode"] = pl.Buffered(x_buffers)

    kernel = functools.partial(_attn_gated_kernel, Dp=Dp)

    A_full = pl.pallas_call(
        kernel,
        out_shape=jax.ShapeDtypeStruct((N, nc_pad), out_dtype),
        grid_spec=pltpu.PrefetchScalarGridSpec(
            num_scalar_prefetch=0,
            grid=grid,
            in_specs=[
                # x tiled over rows.
                pl.BlockSpec((tile, L), lambda i: (i, 0), **x_spec_kwargs),
                # Fused weights / biases: constant index maps -> VMEM-resident,
                # not re-streamed per grid step.
                pl.BlockSpec((L, 2 * Dp), lambda i: (0, 0)),
                pl.BlockSpec((1, 2 * Dp), lambda i: (0, 0)),
                pl.BlockSpec((Dp, nc_pad), lambda i: (0, 0)),
                pl.BlockSpec((1, nc_pad), lambda i: (0, 0)),
            ],
            out_specs=pl.BlockSpec((tile, nc_pad), lambda i: (i, 0)),
        ),
        compiler_params=pltpu.CompilerParams(
            dimension_semantics=("parallel",),
            vmem_limit_bytes=vmem_limit,
        ),
    )(x_c, prepared["wab"], prepared["bab"], prepared["wc"], prepared["bc"])

    # Strip class padding; rows past N are never written back by Pallas.
    A = A_full[:, :n_classes]
    return A, x


# ----------------------------------------------------------------------------
# Reference / init (for the self-test)
# ----------------------------------------------------------------------------
def init_params(key, L, D, n_classes, dtype=jnp.float32):
    """Deterministic init mimicking nn.Linear default (uniform +/- 1/sqrt(fan_in))."""
    k = jax.random.split(key, 6)
    la = 1.0 / jnp.sqrt(L)
    lc = 1.0 / jnp.sqrt(D)
    return {
        "wa": jax.random.uniform(k[0], (L, D), dtype, -la, la),
        "ba": jax.random.uniform(k[1], (1, D), dtype, -la, la),
        "wb": jax.random.uniform(k[2], (L, D), dtype, -la, la),
        "bb": jax.random.uniform(k[3], (1, D), dtype, -la, la),
        "wc": jax.random.uniform(k[4], (D, n_classes), dtype, -lc, lc),
        "bc": jax.random.uniform(k[5], (1, n_classes), dtype, -lc, lc),
    }


def reference_forward(x, params):
    a = jnp.tanh(x @ params["wa"] + params["ba"])
    b = jax.nn.sigmoid(x @ params["wb"] + params["bb"])
    A = (a * b) @ params["wc"] + params["bc"]
    return A, x


# TODO(synk): optional nn.Dropout(0.25) branch (dropout=True) is not implemented;
# the module default (dropout=False) is what this kernel reproduces.

if __name__ == "__main__":
    # Small shapes consistent with the module (L=1024, D=256 scaled down).
    # N deliberately NOT a multiple of the tile to exercise the partial block.
    N, L, D, n_classes = 300, 256, 128, 1

    key = jax.random.PRNGKey(0)
    kx, kp = jax.random.split(key)
    x = jax.random.normal(kx, (N, L), jnp.float32)
    params = init_params(kp, L, D, n_classes)

    # Production path: bf16 MXU compute, f32 accumulation (tile=160, grid=2).
    prep_bf16 = prepare_params(params, compute_dtype=jnp.bfloat16)
    A_bf16, x_out = jax.block_until_ready(attn_net_gated_forward(x, prep_bf16))

    # Validation path: f32 compute, smaller tile -> multi-step grid with a
    # partial last block (tile=64, grid=5).
    prep_f32 = prepare_params(params, compute_dtype=jnp.float32)
    A_f32, _ = jax.block_until_ready(
        attn_net_gated_forward(x, prep_f32, tile_n=64))

    A_ref, _ = reference_forward(x, params)
    assert A_bf16.shape == (N, n_classes)
    assert A_f32.shape == (N, n_classes)
    assert x_out.shape == (N, L)
    assert jnp.array_equal(x_out, x)
    # f32 path: tight agreement with the f32 reference.
    assert jnp.allclose(A_f32, A_ref, atol=1e-3, rtol=1e-3)
    # bf16 path: looser tolerance (bf16 operands, f32 accumulation).
    assert jnp.allclose(A_bf16, A_ref, atol=2e-2, rtol=2e-2)

    print("KERNEL_OK")
</pallas_src>

<mosaic_0001>
module attributes {stable_mosaic.version = 11 : i64} {
  func.func @_attn_gated_kernel(%arg0: i32, %arg1: memref<160x256xbf16, #tpu.memory_space<vmem>>, %arg2: memref<256x256xbf16, #tpu.memory_space<vmem>>, %arg3: memref<1x256xf32, #tpu.memory_space<vmem>>, %arg4: memref<128x128xbf16, #tpu.memory_space<vmem>>, %arg5: memref<1x128xf32, #tpu.memory_space<vmem>>, %arg6: memref<160x128xf32, #tpu.memory_space<vmem>>) attributes {dimension_semantics = [#tpu.dimension_semantics<parallel>], iteration_bounds = array<i64: 2>, scalar_prefetch = 0 : i64, scratch_operands = 0 : i64, tpu.core_type = #tpu.core_type<tc>, window_params = [{transform_indices = @transform_0, window_bounds = array<i64: 160, 256>}, {pipeline_mode = #tpu.pipeline_mode<synchronous>, transform_indices = @transform_1, window_bounds = array<i64: 256, 256>}, {pipeline_mode = #tpu.pipeline_mode<synchronous>, transform_indices = @transform_2, window_bounds = array<i64: 1, 256>}, {pipeline_mode = #tpu.pipeline_mode<synchronous>, transform_indices = @transform_3, window_bounds = array<i64: 128, 128>}, {pipeline_mode = #tpu.pipeline_mode<synchronous>, transform_indices = @transform_4, window_bounds = array<i64: 1, 128>}, {transform_indices = @transform_5, window_bounds = array<i64: 160, 128>}]} {
    %c0 = arith.constant 0 : index
    %c0_0 = arith.constant 0 : index
    %0 = vector.load %arg1[%c0, %c0_0] : memref<160x256xbf16, #tpu.memory_space<vmem>>, vector<160x256xbf16>
    %c0_1 = arith.constant 0 : index
    %c0_2 = arith.constant 0 : index
    %1 = vector.load %arg2[%c0_1, %c0_2] : memref<256x256xbf16, #tpu.memory_space<vmem>>, vector<256x256xbf16>
    %cst = arith.constant dense<0.000000e+00> : vector<160x256xf32>
    %2 = tpu.matmul %0, %1, %cst {dimension_numbers = #tpu.dot_dimension_numbers<[1], [0], [0], [1], [0, 0, 1, 1], [], []>} : vector<160x256xbf16>, vector<256x256xbf16>, vector<160x256xf32> -> vector<160x256xf32>
    %c0_3 = arith.constant 0 : index
    %c0_4 = arith.constant 0 : index
    %3 = vector.load %arg3[%c0_3, %c0_4] : memref<1x256xf32, #tpu.memory_space<vmem>>, vector<1x256xf32>
    %4 = vector.broadcast %3 : vector<1x256xf32> to vector<160x256xf32>
    %5 = arith.addf %2, %4 : vector<160x256xf32>
    %6 = vector.extract_strided_slice %5 {offsets = [0, 0], sizes = [160, 128], strides = [1, 1]} : vector<160x256xf32> to vector<160x128xf32>
    %7 = math.tanh %6 : vector<160x128xf32>
    %8 = vector.extract_strided_slice %5 {offsets = [0, 128], sizes = [160, 128], strides = [1, 1]} : vector<160x256xf32> to vector<160x128xf32>
    %cst_5 = arith.constant 5.000000e-01 : f32
    %9 = vector.broadcast %cst_5 : f32 to vector<160x128xf32>
    %10 = arith.mulf %9, %8 : vector<160x128xf32>
    %11 = math.tanh %10 : vector<160x128xf32>
    %cst_6 = arith.constant 1.000000e+00 : f32
    %12 = vector.broadcast %cst_6 : f32 to vector<160x128xf32>
    %13 = arith.addf %11, %12 : vector<160x128xf32>
    %cst_7 = arith.constant 5.000000e-01 : f32
    %14 = vector.broadcast %cst_7 : f32 to vector<160x128xf32>
    %15 = arith.mulf %14, %13 : vector<160x128xf32>
    %16 = arith.mulf %7, %15 : vector<160x128xf32>
    %17 = arith.truncf %16 : vector<160x128xf32> to vector<160x128xbf16>
    %c0_8 = arith.constant 0 : index
    %c0_9 = arith.constant 0 : index
    %18 = vector.load %arg4[%c0_8, %c0_9] : memref<128x128xbf16, #tpu.memory_space<vmem>>, vector<128x128xbf16>
    %cst_10 = arith.constant dense<0.000000e+00> : vector<160x128xf32>
    %19 = tpu.matmul %17, %18, %cst_10 {dimension_numbers = #tpu.dot_dimension_numbers<[1], [0], [0], [1], [0, 0, 1, 1], [], []>} : vector<160x128xbf16>, vector<128x128xbf16>, vector<160x128xf32> -> vector<160x128xf32>
    %c0_11 = arith.constant 0 : index
    %c0_12 = arith.constant 0 : index
    %20 = vector.load %arg5[%c0_11, %c0_12] : memref<1x128xf32, #tpu.memory_space<vmem>>, vector<1x128xf32>
    %21 = vector.broadcast %20 : vector<1x128xf32> to vector<160x128xf32>
    %22 = arith.addf %19, %21 : vector<160x128xf32>
    %c0_13 = arith.constant 0 : index
    %c0_14 = arith.constant 0 : index
    %23 = vector.load %arg6[%c0_13, %c0_14] : memref<160x128xf32, #tpu.memory_space<vmem>>, vector<160x128xf32>
    tpu.vector_store %arg6[%c0_13, %c0_14], %22 {strides = array<i32>} : memref<160x128xf32, #tpu.memory_space<vmem>>, vector<160x128xf32>,
    return
  }
  func.func @transform_0(%arg0: i32) -> (i32, i32) {
    %c0_i32 = arith.constant 0 : i32
    %c0_i32_0 = arith.constant 0 : i32
    return %arg0, %c0_i32 : i32, i32
  }
  func.func @transform_1(%arg0: i32) -> (i32, i32) {
    %c0_i32 = arith.constant 0 : i32
    %c0_i32_0 = arith.constant 0 : i32
    %c0_i32_1 = arith.constant 0 : i32
    return %c0_i32, %c0_i32_0 : i32, i32
  }
  func.func @transform_2(%arg0: i32) -> (i32, i32) {
    %c0_i32 = arith.constant 0 : i32
    %c0_i32_0 = arith.constant 0 : i32
    %c0_i32_1 = arith.constant 0 : i32
    return %c0_i32, %c0_i32_0 : i32, i32
  }
  func.func @transform_3(%arg0: i32) -> (i32, i32) {
    %c0_i32 = arith.constant 0 : i32
    %c0_i32_0 = arith.constant 0 : i32
    %c0_i32_1 = arith.constant 0 : i32
    return %c0_i32, %c0_i32_0 : i32, i32
  }
  func.func @transform_4(%arg0: i32) -> (i32, i32) {
    %c0_i32 = arith.constant 0 : i32
    %c0_i32_0 = arith.constant 0 : i32
    %c0_i32_1 = arith.constant 0 : i32
    return %c0_i32, %c0_i32_0 : i32, i32
  }
  func.func @transform_5(%arg0: i32) -> (i32, i32) {
    %c0_i32 = arith.constant 0 : i32
    %c0_i32_0 = arith.constant 0 : i32
    return %arg0, %c0_i32 : i32, i32
  }
}

</mosaic_0001>

<bundles_post_ra>
// kernel: tpu_custom_call.1
= control target key start
LH: loop header
LB: loop body
LE: loop exit
PB: predicated region body
PF: predicated region fallthrough
CT: control target
= control target key end

     0   :  { %10 = vsyncpa [#allocation3], 0  ;;  %s2074_s0 = inlined_call_operand.hbm [shape: bf16[300,256], index: 0, kind: input, shape index: {}]   ;;  %s2075_s1 = inlined_call_operand.hbm [shape: bf16[256,256], index: 1, kind: input, shape index: {}]   ;;  %s2076_s2 = inlined_call_operand.vmem [shape: f32[1,256], index: 2, kind: input, shape index: {}]   ;;  %s2077_s3 = inlined_call_operand.hbm [shape: bf16[128,128], index: 3, kind: input, shape index: {}]   ;;  %s2078_s4 = inlined_call_operand.vmem [shape: f32[1,128], index: 4, kind: input, shape index: {}]   ;;  %s2079_s5 = inlined_call_operand.hbm [shape: f32[300,128], index: 5, kind: output, shape index: {}]  }
   0x1   :  { %12 = vsyncpa [#allocation3 + $0x1], 0 }
   0x2   :  { %13 = vsyncpa [#allocation6], 0 }
   0x3   :  { %14 = vsyncpa [#allocation4], 0 }
   0x4   :  { %16 = vsyncpa [#allocation4 + $0x1], 0  ;;  %s1763_s18 = smov 0   ;;  %s1765_s19 = smov 0  }
   0x5   :  { %s1767_s20 = smov 0   ;;  %s1769_s21 = smov 0  }
   0x6 LB: > { %s1784_s22 = sadd.s32 4294967295, %s1719_s21   ;;  %s1195_s23 = sadd.s32 4294967294, %s1719_s21   ;;  %s1719_s21 = sphi %s1769_s21, %s2096_s21   ;;  %s1715_s20 = sphi %s1767_s20, %s2095_s20   ;;  %s1711_s19 = sphi %s1765_s19, %s2094_s19   ;;  %s1707_s18 = sphi %s1763_s18, %s2093_s18  }
   0x7   : > { %s1788_s24 = sadd.s32 1, %s1719_s21   ;;  %s29_s25 = sadd.s32 1, %s1715_s20 }
   0x8   : > { %s26_s26 = ssub.s32 %s1719_s21, %s1788_s24  ;;  %p36_p0 = scmp.ne.s32.totalorder %s1715_s20, %s1711_s19 }
   0x9   : > { %p27_p1 = scmp.eq.s32.totalorder %s26_s26, 0  ;;  %p37_p2 = scmp.eq.s32.totalorder %s1719_s21, 0 }
   0xa   : > { %p42_p3 = scmp.ne.s32.totalorder %s1711_s19, %s1707_s18  ;;  %p2080_p4 = scmp.eq.s32.totalorder %s1784_s22, 0 }
   0xb   : > { %s1800_s27 = scalar_select %p27_p1, %s1715_s20, %s29_s25  }
   0xc   : > { %p1802_p5 = por %p37_p2, %p36_p0  ;;  %p1808_p6 = por %p2080_p4, %p42_p3 }
   0xd   : > { %p150_p7 = scmp.eq.s32.totalorder %s1784_s22, 1  ;;  %p156_p8 = scmp.eq.s32.totalorder %s1195_s23, 1 }
   0xe   : > { %s2083_s29 = scalar_select %p1808_p6, 1, 0 }
   0xf   : > { %p1196_p9 = scmp.ge.s32.totalorder %s1719_s21, 1  ;;  %p163_p10 = scmp.lt.s32.totalorder %s1719_s21, 3 }
  0x10   : > { %p1815_p11 = por %p150_p7, %p36_p0  ;;  %p1819_p12 = por %p156_p8, %p42_p3 }
  0x11   : > { %p1823_p13 = pnand %p1196_p9, %p163_p10  ;;  %s1721_s8 = smov [#allocation5]  }
  0x12   : > { %s2084_s30 = scalar_select %p1815_p11, 1, 0 }
  0x13   : > { %s2085_s6 = scalar_select %p1819_p12, 1, 0 }
  0x14   : > { %p1349_p1 = pneg %p1823_p13  ;;  %s175_s9 = sshll.u32 %s1721_s8, 4  ;;  %s176_s9 = int_to_ptr.vmem [resolvable:$true] %s175_s9 }
  0x15   : > { %s1722_s11 = smov [#allocation7]   ;;  %s1584_s13 = scalar_lea.vmem %s176_s9, 4096 }
  0x16   : > { %p1831_p2 = pnand %p1349_p1, %p2080_p4  ;;  %s191_s12 = sshll.u32 %s1722_s11, 4  ;;  %s192_s12 = int_to_ptr.vmem [resolvable:$true] %s191_s12 }
  0x17   : > { %p1585_p3 = scmp.ne.s32.totalorder %s176_s9, %s1584_s13  ;;  %p1592_p9 = scmp.lt.s32.totalorder %s176_s9, %s176_s9 }
  0x18   : > { %p1575_p0 = pneg %p1831_p2  ;;  %p1593_p10 = scmp.lt.s32.totalorder %s1584_s13, %s1584_s13 }
  0x1a   : > { %p1587_p7 = pnand %p1585_p3, %p1575_p0  ;;  %p1594_p12 = por %p1593_p10, %p1592_p9 }
  0x1c   : > { %p1588_p8 = pneg %p1587_p7 }
  0x1e   : > { %p1595_p1 = pnand %p1594_p12, %p1588_p8 }
  0x20   : > { %1598 = shalt.err (!%p1595_p1)
}
  0x21   : > { %s1723_s14 = smov 128   ;;  %s1724_s15 = smov 8  }
  0x22   : > { %1352 = dma.hbm_to_vmem [thread:$0]  (!%p1831_p2), %s2075_s1, 4096, %s176_s9, [#allocation6], %s1723_s14, %s1723_s14, %s1724_s15  }
  0x23   : > { %s1610_s23 = scalar_lea.vmem %s192_s12, 1024  ;;  %p1618_p11 = scmp.lt.s32.totalorder %s192_s12, %s192_s12 }
  0x24   : > { %p1611_p4 = scmp.ne.s32.totalorder %s192_s12, %s1610_s23  ;;  %p1619_p6 = scmp.lt.s32.totalorder %s1610_s23, %s1610_s23 }
  0x26   : > { %p1613_p3 = pnand %p1611_p4, %p1575_p0  ;;  %p1620_p9 = por %p1619_p6, %p1618_p11 }
  0x28   : > { %p1614_p7 = pneg %p1613_p3 }
  0x2a   : > { %p1621_p12 = pnand %p1620_p9, %p1614_p7 }
  0x2c   : > { %1624 = shalt.err (!%p1621_p12)
}
  0x2d   : > { %s1725_s25 = smov 64   ;;  %s1726_s26 = smov 4  }
  0x2e   : > { %1355 = dma.hbm_to_vmem [thread:$0]  (!%p1831_p2), %s2077_s3, 1024, %s192_s12, [#allocation6], %s1725_s25, %s1725_s25, %s1726_s26  }
  0x2f   : > { %p1199_p8 = scmp.ge.s32.totalorder %s1719_s21, 2 }
  0x31   : > { %204 = sbr.rel (%p1199_p8) target bundleno = 88 (0x58), region = 32 }
  0x36   : > { %207 = sbr.rel (!%p1802_p5) target bundleno = 88 (0x58), region = 36  ;;  %s208_s9 = sand.u32 (%p1802_p5), 1, %s1715_s20  }
  0x37   : > { %s213_s13 = smul.u32 (%p1802_p5), 20, %s1719_s21  ;;  %s1863_s16 = scalar_lea.sflag (%p1802_p5), [#allocation3], %s208_s9 }
  0x38   : > { %s1337_s14 = smul.u32 (%p1802_p5), 160, %s208_s9 }
  0x39   : > { %s214_s15 = ssub.s32 (%p1802_p5), 38, %s213_s13 }
  0x3a   : > { %p215_p4 = scmp.lt.s32.totalorder (%p1802_p5), %s214_s15, 20  ;;  %s212_s17 = scalar_lea.vmem (%p1802_p5), [#allocation2], %s1337_s14 }
  0x3c   : > { %s2098_s15 = smov (!%p215_p4, %s214_s15), 20 }
  0x3d   : > { %s1860_s10 = sshll.u32 %s2098_s15, 7 }
  0x3e   : > { %s220_s12 = ssub.s32 2560, %s1860_s10 }
  0x3f   : > { %221 = vsyncadd %s1863_s16, %s220_s12  ;;  %p1202_p5 = scmp.ne.s32.totalorder %s1860_s10, 0  ;;  %s1282_s28 = smul.u32 2560, %s1719_s21 }
  0x40   : > { %s227_s23 = sshll.u32 %s212_s17, 4  ;;  %s1629_s14 = scalar_lea.hbm %s2074_s0, 4864  ;;  %s1873_s23 = int_to_ptr.vmem [resolvable:$true] %s227_s23 }
  0x41   : > { %s1871_s8 = scalar_lea.hbm %s2074_s0, %s1282_s28 }
  0x42   : > { %s1625_s11 = scalar_lea.hbm %s1871_s8, %s1860_s10  ;;  %p1630_p0 = scmp.lt.s32.totalorder %s1871_s8, %s2074_s0 }
  0x43   : > { %p1626_p6 = scmp.ne.s32.totalorder %s1871_s8, %s1625_s11  ;;  %p1631_p10 = scmp.lt.s32.totalorder %s1629_s14, %s1625_s11 }
  0x45   : > { %p1627_p11 = pnand %p1626_p6, %p1202_p5  ;;  %p1632_p1 = por %p1631_p10, %p1630_p0 }
  0x47   : > { %p1628_p2 = pneg %p1627_p11 }
  0x49   : > { %p1633_p3 = pnand %p1632_p1, %p1628_p2 }
  0x4b   : > { %1636 = shalt.err (!%p1633_p3)
}
  0x4c   : > { %s1637_s17 = scalar_lea.vmem %s1873_s23, %s1860_s10  ;;  %s1727_s28 = smov [#allocation2]  }
  0x4d   : > { %p1638_p7 = scmp.ne.s32.totalorder %s1873_s23, %s1637_s17  ;;  %s1641_s25 = sshll.u32 %s1727_s28, 4  ;;  %s1642_s25 = int_to_ptr.vmem [resolvable:$false] %s1641_s25 }
  0x4e   : > { %s1643_s26 = scalar_lea.vmem %s1642_s25, 5120  ;;  %p1644_p4 = scmp.lt.s32.totalorder %s1873_s23, %s1642_s25 }
  0x4f   : > { %p1639_p9 = pnand %p1638_p7, %p1202_p5  ;;  %p1645_p6 = scmp.lt.s32.totalorder %s1643_s26, %s1637_s17 }
  0x51   : > { %p1640_p12 = pneg %p1639_p9  ;;  %p1646_p11 = por %p1645_p6, %p1644_p4 }
  0x53   : > { %p1647_p0 = pnand %p1646_p11, %p1640_p12 }
  0x55   : > { %1650 = shalt.err (!%p1647_p0)
}
  0x56   : > { %s1728_s11 = smov 128   ;;  %s1729_s9 = smov 8  }
  0x57   : > { %233 = dma.hbm_to_vmem [thread:$0]  (%p1202_p5), %s1871_s8, %s1860_s10, %s1873_s23, %s1863_s16, %s1728_s11, %s1728_s11, %s1729_s9  }
  0x58 PF: > { %239 = sbr.rel (%p1823_p13) target bundleno = 688 (0x2b0), region = 40  ;;  %s1902_s13 = sand.u32 (!%p1823_p13), 1, %s1711_s19  }
  0x59   : > { %s1338_s14 = smul.u32 (!%p1823_p13), 160, %s1902_s13  ;;  %s242_s15 = scalar_lea.sflag (!%p1823_p13), [#allocation3], %s1902_s13 }
  0x5a   : > { %p2088_p2 = scmp.ne.s32.totalorder (!%p1823_p13), %s2083_s29, 0 }
  0x5b   : > { %s1908_s12 = scalar_lea.vmem (!%p1823_p13), [#allocation2], %s1338_s14 }
  0x5d   : > { %1694 = dma.done.wait (%p2088_p2), %s242_s15, 2560  }
  0x5e   : > { %1696 = vsyncadd (%p2088_p2), %s242_s15, 4294964736  ;;  %p2089_p5 = scmp.eq.s32.totalorder %s1784_s22, 0 }
  0x60   : > { %1698 = dma.done.wait (%p2089_p5), [#allocation6], 5120   ;;  %p2090_p13 = pmov %p2089_p5 }
  0x61   : > { %v1407_v0 = vld [vmem:[#allocation5 + $0x74] ss:$8 sps:$4 sm:$0xff]   ;;  %v1409_v1 = vld [vmem:[#allocation5 + $0x70] ss:$8 sps:$4 sm:$0xff]   ;;  %v1410_v2 = vld [vmem:[#allocation5 + $0x64] ss:$8 sps:$4 sm:$0xff]   ;;  %v346_v60 = vlaneseq }
  0x62   : > { %1700 = vsyncadd (%p2090_p13), [#allocation6], 4294962176  ;;  %616 = vmatprep.subr.bf16.mxu0 %v1407_v0  ;;  %v1412_v3 = vld [vmem:[#allocation5 + $0x60] ss:$8 sps:$4 sm:$0xff]   ;;  %v1413_v4 = vld [vmem:[#allocation5 + $0x54] ss:$8 sps:$4 sm:$0xff]  }
  0x63   : > { %617 = vmatpush1.bf16.msra.mxu0 %v1409_v1  ;;  %v1415_v5 = vld [vmem:[#allocation5 + $0x50] ss:$8 sps:$4 sm:$0xff]   ;;  %v1416_v6 = vld [vmem:[#allocation5 + $0x44] ss:$8 sps:$4 sm:$0xff]   ;;  %v1418_v7 = vld [vmem:[#allocation5 + $0x40] ss:$8 sps:$4 sm:$0xff]  }
  0x64   : > { %618 = vmatprep.subr.bf16.mxu0 %v1410_v2  ;;  %v1419_v8 = vld [vmem:[#allocation5 + $0x34] ss:$8 sps:$4 sm:$0xff]   ;;  %v1421_v9 = vld [vmem:[#allocation5 + $0x30] ss:$8 sps:$4 sm:$0xff]   ;;  %v1422_v10 = vld [vmem:[#allocation5 + $0x24] ss:$8 sps:$4 sm:$0xff]  }
  0x65   : > { %v1424_v11 = vld [vmem:[#allocation5 + $0x20] ss:$8 sps:$4 sm:$0xff]   ;;  %v1425_v12 = vld [vmem:[#allocation5 + $0x14] ss:$8 sps:$4 sm:$0xff]   ;;  %v1457_v13 = vld [vmem:[%s1908_s12 + $0x4] ss:$8 sps:$4 sm:$0xff]  }
  0x66   : > { %v1427_v14 = vld [vmem:[#allocation5 + $0x10] ss:$8 sps:$4 sm:$0xff]   ;;  %v1428_v15 = vld [vmem:[#allocation5 + $0x4] ss:$8 sps:$4 sm:$0xff]   ;;  %648 = vmatprep.mubr.bf16.mxu0 %v1457_v13  ;;  %v1430_v16 = vld [vmem:[#allocation5] ss:$8 sps:$4 sm:$0xff]  }
  0x67   : > { %619 = vmatpush1.bf16.msra.mxu0 %v1412_v3  ;;  %v1431_v17 = vld [vmem:[#allocation5 + $0xf4] ss:$8 sps:$4 sm:$0xff]   ;;  %v1433_v18 = vld [vmem:[#allocation5 + $0xf0] ss:$8 sps:$4 sm:$0xff]   ;;  %v1434_v19 = vld [vmem:[#allocation5 + $0xe4] ss:$8 sps:$4 sm:$0xff]  }
  0x68   : > { %620 = vmatprep.subr.bf16.mxu0 %v1413_v4  ;;  %v1436_v20 = vld [vmem:[#allocation5 + $0xe0] ss:$8 sps:$4 sm:$0xff]   ;;  %v1437_v21 = vld [vmem:[#allocation5 + $0xd4] ss:$8 sps:$4 sm:$0xff]   ;;  %v1439_v22 = vld [vmem:[#allocation5 + $0xd0] ss:$8 sps:$4 sm:$0xff]  }
  0x69   : > { %v1440_v23 = vld [vmem:[#allocation5 + $0xc4] ss:$8 sps:$4 sm:$0xff]   ;;  %v1442_v24 = vld [vmem:[#allocation5 + $0xc0] ss:$8 sps:$4 sm:$0xff]   ;;  %v1443_v25 = vld [vmem:[#allocation5 + $0xb4] ss:$8 sps:$4 sm:$0xff]  }
  0x6a   : > { %v1445_v26 = vld [vmem:[#allocation5 + $0xb0] ss:$8 sps:$4 sm:$0xff]   ;;  %v1446_v27 = vld [vmem:[#allocation5 + $0xa4] ss:$8 sps:$4 sm:$0xff]   ;;  %v1448_v28 = vld [vmem:[#allocation5 + $0xa0] ss:$8 sps:$4 sm:$0xff]  }
  0x6b   : > { %621 = vmatpush1.bf16.msra.mxu0 %v1415_v5  ;;  %v1449_v29 = vld [vmem:[#allocation5 + $0x94] ss:$8 sps:$4 sm:$0xff]   ;;  %v1451_v30 = vld [vmem:[#allocation5 + $0x90] ss:$8 sps:$4 sm:$0xff]   ;;  %v1452_v31 = vld [vmem:[#allocation5 + $0x84] ss:$8 sps:$4 sm:$0xff]  }
  0x6c   : > { %622 = vmatprep.subr.bf16.mxu0 %v1416_v6  ;;  %v1454_v32 = vld [vmem:[#allocation5 + $0x80] ss:$8 sps:$4 sm:$0xff]   ;;  %v1458_v34 = vld [vmem:[%s1908_s12 + $0x14] ss:$8 sps:$4 sm:$0xff]   ;;  %v1460_v35 = vld [vmem:[%s1908_s12 + $0x10] ss:$8 sps:$4 sm:$0xff]  }
  0x6d   : > { %v1455_v33 = vld [vmem:[%s1908_s12] ss:$8 sps:$4 sm:$0xff]   ;;  %v1461_v36 = vld [vmem:[%s1908_s12 + $0x24] ss:$8 sps:$4 sm:$0xff]   ;;  %v1464_v38 = vld [vmem:[%s1908_s12 + $0x34] ss:$8 sps:$4 sm:$0xff]  }
  0x6e   : > { %v1463_v37 = vld [vmem:[%s1908_s12 + $0x20] ss:$8 sps:$4 sm:$0xff]   ;;  %v1466_v39 = vld [vmem:[%s1908_s12 + $0x30] ss:$8 sps:$4 sm:$0xff]   ;;  %v1467_v40 = vld [vmem:[%s1908_s12 + $0x44] ss:$8 sps:$4 sm:$0xff]  }
  0x6f   : > { %623 = vmatpush1.bf16.msra.mxu0 %v1418_v7  ;;  %v1469_v41 = vld [vmem:[%s1908_s12 + $0x40] ss:$8 sps:$4 sm:$0xff]   ;;  %v1470_v42 = vld [vmem:[%s1908_s12 + $0x54] ss:$8 sps:$4 sm:$0xff]   ;;  %v1472_v43 = vld [vmem:[%s1908_s12 + $0x50] ss:$8 sps:$4 sm:$0xff]  }
  0x70   : > { %624 = vmatprep.subr.bf16.mxu0 %v1419_v8  ;;  %v1473_v44 = vld [vmem:[%s1908_s12 + $0x64] ss:$8 sps:$4 sm:$0xff]   ;;  %v1475_v45 = vld [vmem:[%s1908_s12 + $0x60] ss:$8 sps:$4 sm:$0xff]   ;;  %v1476_v46 = vld [vmem:[%s1908_s12 + $0x74] ss:$8 sps:$4 sm:$0xff]  }
  0x71   : > { %v1478_v47 = vld [vmem:[%s1908_s12 + $0x70] ss:$8 sps:$4 sm:$0xff]   ;;  %v1479_v48 = vld [vmem:[%s1908_s12 + $0x84] ss:$8 sps:$4 sm:$0xff]   ;;  %v1481_v49 = vld [vmem:[%s1908_s12 + $0x80] ss:$8 sps:$4 sm:$0xff]  }
  0x72   : > { %v1482_v50 = vld [vmem:[%s1908_s12 + $0x94] ss:$8 sps:$4 sm:$0xff]   ;;  %v1484_v51 = vld [vmem:[%s1908_s12 + $0x90] ss:$8 sps:$4 sm:$0xff]   ;;  %v1487_v54 = vld [vmem:[#allocation7 + $0x28] sm:$0xff]   ;;  %v347_v61 = vshrl.u32 %v346_v60, 7 }
  0x73   : > { %625 = vmatpush1.bf16.msra.mxu0 %v1421_v9  ;;  %v1485_v52 = vld [vmem:[#allocation7 + $0x38] sm:$0xff]   ;;  %v1486_v53 = vld [vmem:[#allocation7 + $0x30] sm:$0xff]   ;;  %v1488_v55 = vld [vmem:[#allocation7 + $0x20] sm:$0xff]   ;;  %s1990_s23 = scalar_lea.vmem [#allocation8], %s1338_s14  ;;  %s1084_s8 = scalar_lea.sflag [#allocation4], %s1902_s13 }
  0x74   : > { %626 = vmatprep.subr.bf16.mxu0 %v1422_v10  ;;  %1301 = vmatprep.subr.bf16.mxu1 %v1485_v52  ;;  %v1489_v56 = vld [vmem:[#allocation7 + $0x18] sm:$0xff]   ;;  %v1490_v57 = vld [vmem:[#allocation7 + $0x10] sm:$0xff]   ;;  %v1491_v58 = vld [vmem:[#allocation7 + $0x8] sm:$0xff]   ;;  %v352_v62 = vsub.s32 1, %v347_v61  ;;  %v348_v2 = vsub.s32 0, %v347_v61  ;;  %p2091_p10 = scmp.ne.s32.totalorder %s2084_s30, 0 }
  0x75   : > { %1302 = vmatpush3.bf16.msra.mxu1 %v1485_v52  ;;  %v1492_v59 = vld [vmem:[#allocation7] sm:$0xff]   ;;  %s1091_s17 = smul.u32 (%p2091_p10), 20, %s1784_s22 }
  0x76   : > { %1303 = vmatprep.subr.bf16.mxu1 %v1486_v53  ;;  %v344_v63 = vld [vmem:[%s2076_s2] sm:$0x3] }
  0x77   : > { %627 = vmatpush1.bf16.msra.mxu0 %v1424_v11  ;;  %v1941_v0 = vrot.slane %v344_v63, %v352_v62  ;;  %v1944_v6 = vrot.slane %v344_v63, %v348_v2  ;;  %s1092_s28 = ssub.s32 (%p2091_p10), 38, %s1091_s17 }
  0x78   : > { %628 = vmatprep.subr.bf16.mxu0 %v1425_v12  ;;  %p1093_p1 = scmp.lt.s32.totalorder (%p2091_p10), %s1092_s28, 20 }
  0x79   : > { %1304 = vmatpush3.bf16.msra.mxu1 %v1486_v53 }
  0x7a   : > { %1305 = vmatprep.subr.bf16.mxu1 %v1487_v54 }
  0x7b   : > { %629 = vmatpush1.bf16.msra.mxu0 %v1427_v14 }
  0x7c   : > { %630 = vmatprep.subr.bf16.mxu0 %v1428_v15 }
  0x7d   : > { %1306 = vmatpush3.bf16.msra.mxu1 %v1487_v54 }
  0x7e   : > { %1307 = vmatprep.subr.bf16.mxu1 %v1488_v55 }
  0x7f   : > { %631 = vmatpush1.bf16.msra.mxu0 %v1430_v16 }
  0x80   : > { %632 = vmatprep.subr.bf16.mxu0 %v1431_v17 }
  0x81   : > { %1308 = vmatpush3.bf16.msra.mxu1 %v1488_v55 }
  0x82   : > { %1309 = vmatprep.subr.bf16.mxu1 %v1489_v56 }
  0x83   : > { %633 = vmatpush2.bf16.msra.mxu0 %v1433_v18 }
  0x84   : > { %634 = vmatprep.subr.bf16.mxu0 %v1434_v19 }
  0x85   : > { %1310 = vmatpush3.bf16.msra.mxu1 %v1489_v56 }
  0x86   : > { %1311 = vmatprep.subr.bf16.mxu1 %v1490_v57 }
  0x87   : > { %635 = vmatpush2.bf16.msra.mxu0 %v1436_v20 }
  0x88   : > { %636 = vmatprep.subr.bf16.mxu0 %v1437_v21 }
  0x89   : > { %1312 = vmatpush3.bf16.msra.mxu1 %v1490_v57 }
  0x8a   : > { %1313 = vmatprep.subr.bf16.mxu1 %v1491_v58 }
  0x8b   : > { %637 = vmatpush2.bf16.msra.mxu0 %v1439_v22 }
  0x8c   : > { %638 = vmatprep.subr.bf16.mxu0 %v1440_v23 }
  0x8d   : > { %1314 = vmatpush3.bf16.msra.mxu1 %v1491_v58 }
  0x8e   : > { %1315 = vmatprep.subr.bf16.mxu1 %v1492_v59 }
  0x8f   : > { %639 = vmatpush2.bf16.msra.mxu0 %v1442_v24 }
  0x90   : > { %640 = vmatprep.subr.bf16.mxu0 %v1443_v25 }
  0x91   : > { %1316 = vmatpush3.bf16.msra.mxu1 %v1492_v59 }
  0x93   : > { %641 = vmatpush2.bf16.msra.mxu0 %v1445_v26 }
  0x94   : > { %642 = vmatprep.subr.bf16.mxu0 %v1446_v27 }
  0x97   : > { %643 = vmatpush2.bf16.msra.mxu0 %v1448_v28 }
  0x98   : > { %644 = vmatprep.subr.bf16.mxu0 %v1449_v29 }
  0x9b   : > { %645 = vmatpush2.bf16.msra.mxu0 %v1451_v30 }
  0x9c   : > { %646 = vmatprep.subr.bf16.mxu0 %v1452_v31 }
  0x9f   : > { %647 = vmatpush2.bf16.msra.mxu0 %v1454_v32 }
  0xa2   : > { %649 = vmatmul.mubr.bf16.vlgmr.msra.gmra.mxu0 %v1455_v33 }
  0xa3   : > { %658 = vmatprep.mubr.bf16.mxu0 %v1458_v34 }
  0xaa   : > { %659 = vmatmul.mubr.bf16.gmra.mxu0 %v1460_v35 }
  0xab   : > { %668 = vmatprep.mubr.bf16.mxu0 %v1461_v36 }
  0xb2   : > { %669 = vmatmul.mubr.bf16.gmra.mxu0 %v1463_v37 }
  0xb3   : > { %678 = vmatprep.mubr.bf16.mxu0 %v1464_v38 }
  0xba   : > { %679 = vmatmul.mubr.bf16.gmra.mxu0 %v1466_v39 }
  0xbb   : > { %688 = vmatprep.mubr.bf16.mxu0 %v1467_v40 }
  0xc2   : > { %689 = vmatmul.mubr.bf16.gmra.mxu0 %v1469_v41 }
  0xc3   : > { %698 = vmatprep.mubr.bf16.mxu0 %v1470_v42 }
  0xca   : > { %699 = vmatmul.mubr.bf16.gmra.mxu0 %v1472_v43 }
  0xcb   : > { %708 = vmatprep.mubr.bf16.mxu0 %v1473_v44 }
  0xd2   : > { %709 = vmatmul.mubr.bf16.gmra.mxu0 %v1475_v45 }
  0xd3   : > { %718 = vmatprep.mubr.bf16.mxu0 %v1476_v46 }
  0xda   : > { %719 = vmatmul.mubr.bf16.gmra.mxu0 %v1478_v47 }
  0xdb   : > { %728 = vmatprep.mubr.bf16.mxu0 %v1479_v48 }
  0xe2   : > { %729 = vmatmul.mubr.bf16.gmra.mxu0 %v1481_v49 }
  0xe3   : > { %738 = vmatprep.mubr.bf16.mxu0 %v1482_v50 }
  0xea   : > { %739 = vmatmul.mubr.bf16.gmra.mxu0 %v1484_v51 }
 0x162   : > { %v650_v1 = vpop.f32.mrf.mxu0 }
 0x163   : > { %v651_v11 = vadd.f32 %v650_v1, %v1944_v6 }
 0x164   : > { %v652_v3 = vpop.f32.mrf.mxu0 }
 0x165   : > { %v653_v4 = vadd.f32 %v652_v3, %v1941_v0 }
 0x166   : > { %v654_v5 = vpop.f32.mrf.mxu0 }
 0x167   : > { %v769_v7 = vmul.f32 0.5, %v653_v4  ;;  %v655_v13 = vadd.f32 %v654_v5, %v1944_v6 }
 0x168   : > { %v656_v8 = vpop.f32.mrf.mxu0 }
 0x169   : > { %1493 = vtanh.f32 %v769_v7  ;;  %v657_v9 = vadd.f32 %v656_v8, %v1941_v0 }
 0x16a   : > { %v660_v10 = vpop.f32.mrf.mxu0 }
 0x16b   : > { %v770_v12 = vmul.f32 0.5, %v657_v9  ;;  %v661_v21 = vadd.f32 %v660_v10, %v1944_v6 }
 0x16c   : > { %v662_v14 = vpop.f32.mrf.mxu0 }
 0x16d   : > { %1495 = vtanh.f32 %v770_v12  ;;  %v663_v15 = vadd.f32 %v662_v14, %v1941_v0 }
 0x16e   : > { %v664_v16 = vpop.f32.mrf.mxu0  ;;  %1497 = vtanh.f32 %v651_v11 }
 0x16f   : > { %v771_v17 = vmul.f32 0.5, %v663_v15  ;;  %1499 = vtanh.f32 %v655_v13  ;;  %v665_v23 = vadd.f32 %v664_v16, %v1944_v6 }
 0x170   : > { %v666_v18 = vpop.f32.mrf.mxu0 }
 0x171   : > { %1501 = vtanh.f32 %v771_v17  ;;  %v667_v19 = vadd.f32 %v666_v18, %v1941_v0 }
 0x172   : > { %v670_v20 = vpop.f32.mrf.mxu0 }
 0x173   : > { %v772_v22 = vmul.f32 0.5, %v667_v19  ;;  %v671_v33 = vadd.f32 %v670_v20, %v1944_v6 }
 0x174   : > { %v672_v24 = vpop.f32.mrf.mxu0 }
 0x175   : > { %1503 = vtanh.f32 %v772_v22  ;;  %v673_v25 = vadd.f32 %v672_v24, %v1941_v0 }
 0x176   : > { %v1494_v26 = vpop.eup %1493  ;;  %v674_v27 = vpop.f32.mrf.mxu0  ;;  %1505 = vtanh.f32 %v661_v21 }
 0x177   : > { %v773_v28 = vmul.f32 0.5, %v673_v25  ;;  %v809_v29 = vadd.f32 1.0, %v1494_v26  ;;  %1507 = vtanh.f32 %v665_v23  ;;  %v675_v39 = vadd.f32 %v674_v27, %v1944_v6 }
 0x178   : > { %v676_v30 = vpop.f32.mrf.mxu0 }
 0x179   : > { %1509 = vtanh.f32 %v773_v28  ;;  %v677_v31 = vadd.f32 %v676_v30, %v1941_v0  ;;  %v829_v37 = vmul.f32 0.5, %v809_v29 }
 0x17a   : > { %v1496_v32 = vpop.eup %1495  ;;  %v680_v34 = vpop.f32.mrf.mxu0 }
 0x17b   : > { %v774_v35 = vmul.f32 0.5, %v677_v31  ;;  %v810_v36 = vadd.f32 1.0, %v1496_v32  ;;  %v1498_v38 = vpop.eup %1497  ;;  %v681_v54 = vadd.f32 %v680_v34, %v1944_v6 }
 0x17c   : > { %v682_v40 = vpop.f32.mrf.mxu0  ;;  %v1500_v41 = vpop.eup %1499  ;;  %v849_v48 = vmul.f32 %v1498_v38, %v829_v37 }
 0x17d   : > { %1511 = vtanh.f32 %v774_v35  ;;  %v683_v42 = vadd.f32 %v682_v40, %v1941_v0  ;;  %v830_v43 = vmul.f32 0.5, %v810_v36 }
 0x17e   : > { %v1502_v44 = vpop.eup %1501  ;;  %1513 = vtanh.f32 %v671_v33  ;;  %v684_v45 = vpop.f32.mrf.mxu0 }
 0x17f   : > { %v811_v46 = vadd.f32 1.0, %v1502_v44  ;;  %v775_v47 = vmul.f32 0.5, %v683_v42  ;;  %v850_v49 = vmul.f32 %v1500_v41, %v830_v43  ;;  %1515 = vtanh.f32 %v675_v39 }
 0x180   : > { %v686_v50 = vpop.f32.mrf.mxu0  ;;  %v685_v60 = vadd.f32 %v684_v45, %v1944_v6 }
 0x181   : > { %1517 = vtanh.f32 %v775_v47  ;;  %v687_v51 = vadd.f32 %v686_v50, %v1941_v0  ;;  %v869_v52 = vpack.c.bf16 %v850_v49, %v849_v48  ;;  %v831_v56 = vmul.f32 0.5, %v811_v46 }
 0x182   : > { %v1504_v53 = vpop.eup %1503  ;;  %v690_v55 = vpop.f32.mrf.mxu0 }
 0x183   : > { %v812_v57 = vadd.f32 1.0, %v1504_v53  ;;  %v776_v58 = vmul.f32 0.5, %v687_v51  ;;  %1317 = vmatprep.mubr.bf16.mxu1 %v869_v52  ;;  %v1506_v59 = vpop.eup %1505  ;;  %v691_v13 = vadd.f32 %v690_v55, %v1944_v6 }
 0x184   : > { %v692_v61 = vpop.f32.mrf.mxu0  ;;  %v1508_v62 = vpop.eup %1507  ;;  %v851_v7 = vmul.f32 %v1506_v59, %v831_v56 }
 0x185   : > { %v832_v63 = vmul.f32 0.5, %v812_v57  ;;  %1519 = vtanh.f32 %v776_v58  ;;  %v693_v1 = vadd.f32 %v692_v61, %v1941_v0 }
 0x186   : > { %v1510_v2 = vpop.eup %1509  ;;  %1521 = vtanh.f32 %v681_v54  ;;  %v694_v3 = vpop.f32.mrf.mxu0 }
 0x187   : > { %v813_v4 = vadd.f32 1.0, %v1510_v2  ;;  %v777_v5 = vmul.f32 0.5, %v693_v1  ;;  %v852_v8 = vmul.f32 %v1508_v62, %v832_v63  ;;  %1523 = vtanh.f32 %v685_v60 }
 0x188   : > { %v696_v9 = vpop.f32.mrf.mxu0  ;;  %v695_v19 = vadd.f32 %v694_v3, %v1944_v6 }
 0x189   : > { %1525 = vtanh.f32 %v777_v5  ;;  %v697_v10 = vadd.f32 %v696_v9, %v1941_v0  ;;  %v870_v11 = vpack.c.bf16 %v852_v8, %v851_v7  ;;  %v833_v16 = vmul.f32 0.5, %v813_v4 }
 0x18a   : > { %v1512_v12 = vpop.eup %1511  ;;  %v700_v14 = vpop.f32.mrf.mxu0 }
 0x18b   : > { %v1514_v15 = vpop.eup %1513  ;;  %v814_v17 = vadd.f32 1.0, %v1512_v12  ;;  %v778_v18 = vmul.f32 0.5, %v697_v10  ;;  %1318 = vmatmul.mubr.bf16.vlgmr.msra.gmra.mxu1 %v870_v11  ;;  %v701_v34 = vadd.f32 %v700_v14, %v1944_v6 }
 0x18c   : > { %v702_v20 = vpop.f32.mrf.mxu0  ;;  %v1516_v21 = vpop.eup %1515  ;;  %v853_v28 = vmul.f32 %v1514_v15, %v833_v16 }
 0x18d   : > { %v834_v22 = vmul.f32 0.5, %v814_v17  ;;  %1527 = vtanh.f32 %v778_v18  ;;  %v703_v23 = vadd.f32 %v702_v20, %v1941_v0 }
 0x18e   : > { %v1518_v24 = vpop.eup %1517  ;;  %1529 = vtanh.f32 %v691_v13  ;;  %v704_v25 = vpop.f32.mrf.mxu0 }
 0x18f   : > { %v815_v26 = vadd.f32 1.0, %v1518_v24  ;;  %v779_v27 = vmul.f32 0.5, %v703_v23  ;;  %v854_v29 = vmul.f32 %v1516_v21, %v834_v22  ;;  %1531 = vtanh.f32 %v695_v19 }
 0x190   : > { %v706_v30 = vpop.f32.mrf.mxu0  ;;  %v705_v40 = vadd.f32 %v704_v25, %v1944_v6 }
 0x191   : > { %1533 = vtanh.f32 %v779_v27  ;;  %v707_v31 = vadd.f32 %v706_v30, %v1941_v0  ;;  %v871_v32 = vpack.c.bf16 %v854_v29, %v853_v28  ;;  %v835_v37 = vmul.f32 0.5, %v815_v26 }
 0x192   : > { %v1520_v33 = vpop.eup %1519  ;;  %v710_v35 = vpop.f32.mrf.mxu0 }
 0x193   : > { %v1522_v36 = vpop.eup %1521  ;;  %v816_v38 = vadd.f32 1.0, %v1520_v33  ;;  %v780_v39 = vmul.f32 0.5, %v707_v31  ;;  %1321 = vmatprep.mubr.bf16.mxu1 %v871_v32  ;;  %v711_v55 = vadd.f32 %v710_v35, %v1944_v6 }
 0x194   : > { %v712_v41 = vpop.f32.mrf.mxu0  ;;  %v1524_v42 = vpop.eup %1523  ;;  %v855_v49 = vmul.f32 %v1522_v36, %v835_v37 }
 0x195   : > { %v836_v43 = vmul.f32 0.5, %v816_v38  ;;  %1535 = vtanh.f32 %v780_v39  ;;  %v713_v44 = vadd.f32 %v712_v41, %v1941_v0 }
 0x196   : > { %v1526_v45 = vpop.eup %1525  ;;  %1537 = vtanh.f32 %v701_v34  ;;  %v714_v46 = vpop.f32.mrf.mxu0 }
 0x197   : > { %v817_v47 = vadd.f32 1.0, %v1526_v45  ;;  %v781_v48 = vmul.f32 0.5, %v713_v44  ;;  %v856_v50 = vmul.f32 %v1524_v42, %v836_v43  ;;  %1539 = vtanh.f32 %v705_v40 }
 0x198   : > { %v716_v51 = vpop.f32.mrf.mxu0  ;;  %v715_v61 = vadd.f32 %v714_v46, %v1944_v6 }
 0x199   : > { %1541 = vtanh.f32 %v781_v48  ;;  %v717_v52 = vadd.f32 %v716_v51, %v1941_v0  ;;  %v872_v53 = vpack.c.bf16 %v856_v50, %v855_v49  ;;  %v837_v58 = vmul.f32 0.5, %v817_v47 }
 0x19a   : > { %v1528_v54 = vpop.eup %1527  ;;  %v720_v56 = vpop.f32.mrf.mxu0 }
 0x19b   : > { %v1530_v57 = vpop.eup %1529  ;;  %v818_v59 = vadd.f32 1.0, %v1528_v54  ;;  %v782_v60 = vmul.f32 0.5, %v717_v52  ;;  %1322 = vmatmul.mubr.bf16.gmra.mxu1 %v872_v53  ;;  %v721_v14 = vadd.f32 %v720_v56, %v1944_v6 }
 0x19c   : > { %v722_v62 = vpop.f32.mrf.mxu0  ;;  %v1532_v63 = vpop.eup %1531  ;;  %v857_v8 = vmul.f32 %v1530_v57, %v837_v58 }
 0x19d   : > { %v838_v1 = vmul.f32 0.5, %v818_v59  ;;  %1543 = vtanh.f32 %v782_v60  ;;  %v723_v2 = vadd.f32 %v722_v62, %v1941_v0 }
 0x19e   : > { %v1534_v3 = vpop.eup %1533  ;;  %1545 = vtanh.f32 %v711_v55  ;;  %v724_v4 = vpop.f32.mrf.mxu0 }
 0x19f   : > { %v819_v5 = vadd.f32 1.0, %v1534_v3  ;;  %v783_v7 = vmul.f32 0.5, %v723_v2  ;;  %v858_v9 = vmul.f32 %v1532_v63, %v838_v1  ;;  %1547 = vtanh.f32 %v715_v61 }
 0x1a0   : > { %v726_v10 = vpop.f32.mrf.mxu0  ;;  %v725_v20 = vadd.f32 %v724_v4, %v1944_v6 }
 0x1a1   : > { %1549 = vtanh.f32 %v783_v7  ;;  %v727_v11 = vadd.f32 %v726_v10, %v1941_v0  ;;  %v873_v12 = vpack.c.bf16 %v858_v9, %v857_v8  ;;  %v839_v17 = vmul.f32 0.5, %v819_v5 }
 0x1a2   : > { %v1536_v13 = vpop.eup %1535  ;;  %v730_v15 = vpop.f32.mrf.mxu0 }
 0x1a3   : > { %v1538_v16 = vpop.eup %1537  ;;  %v820_v18 = vadd.f32 1.0, %v1536_v13  ;;  %v784_v19 = vmul.f32 0.5, %v727_v11  ;;  %1325 = vmatprep.mubr.bf16.mxu1 %v873_v12  ;;  %v731_v35 = vadd.f32 %v730_v15, %v1944_v6 }
 0x1a4   : > { %v732_v21 = vpop.f32.mrf.mxu0  ;;  %v1540_v22 = vpop.eup %1539  ;;  %v859_v29 = vmul.f32 %v1538_v16, %v839_v17 }
 0x1a5   : > { %v840_v23 = vmul.f32 0.5, %v820_v18  ;;  %1551 = vtanh.f32 %v784_v19  ;;  %v733_v24 = vadd.f32 %v732_v21, %v1941_v0 }
 0x1a6   : > { %v1542_v25 = vpop.eup %1541  ;;  %1553 = vtanh.f32 %v721_v14  ;;  %v734_v26 = vpop.f32.mrf.mxu0 }
 0x1a7   : > { %v821_v27 = vadd.f32 1.0, %v1542_v25  ;;  %v785_v28 = vmul.f32 0.5, %v733_v24  ;;  %v860_v30 = vmul.f32 %v1540_v22, %v840_v23  ;;  %1555 = vtanh.f32 %v725_v20  ;;  %v1262_v25 = vld [vmem:[%s2078_s4] ss:$0 sm:$0xff] }
 0x1a8   : > { %v736_v31 = vpop.f32.mrf.mxu0  ;;  %v735_v41 = vadd.f32 %v734_v26, %v1944_v6 }
 0x1a9   : > { %1557 = vtanh.f32 %v785_v28  ;;  %v737_v32 = vadd.f32 %v736_v31, %v1941_v0  ;;  %v874_v33 = vpack.c.bf16 %v860_v30, %v859_v29  ;;  %v841_v38 = vmul.f32 0.5, %v821_v27 }
 0x1aa   : > { %v1544_v34 = vpop.eup %1543  ;;  %v740_v36 = vpop.f32.mrf.mxu0 }
 0x1ab   : > { %v1546_v37 = vpop.eup %1545  ;;  %v822_v39 = vadd.f32 1.0, %v1544_v34  ;;  %v786_v40 = vmul.f32 0.5, %v737_v32  ;;  %1326 = vmatmul.mubr.bf16.gmra.mxu1 %v874_v33  ;;  %v741_v60 = vadd.f32 %v740_v36, %v1944_v6 }
 0x1ac   : > { %v742_v42 = vpop.f32.mrf.mxu0  ;;  %v1548_v43 = vpop.eup %1547  ;;  %v861_v50 = vmul.f32 %v1546_v37, %v841_v38 }
 0x1ad   : > { %v842_v44 = vmul.f32 0.5, %v822_v39  ;;  %1559 = vtanh.f32 %v786_v40  ;;  %v743_v45 = vadd.f32 %v742_v42, %v1941_v0 }
 0x1ae   : > { %v1550_v46 = vpop.eup %1549  ;;  %1561 = vtanh.f32 %v731_v35  ;;  %v744_v47 = vpop.f32.mrf.mxu0 }
 0x1af   : > { %v823_v48 = vadd.f32 1.0, %v1550_v46  ;;  %v787_v49 = vmul.f32 0.5, %v743_v45  ;;  %v862_v51 = vmul.f32 %v1548_v43, %v842_v44  ;;  %1563 = vtanh.f32 %v735_v41 }
 0x1b0   : > { %v746_v52 = vpop.f32.mrf.mxu0  ;;  %v745_v63 = vadd.f32 %v744_v47, %v1944_v6 }
 0x1b1   : > { %1565 = vtanh.f32 %v787_v49  ;;  %v747_v53 = vadd.f32 %v746_v52, %v1941_v0  ;;  %v875_v54 = vpack.c.bf16 %v862_v51, %v861_v50  ;;  %v843_v57 = vmul.f32 0.5, %v823_v48 }
 0x1b2   : > { %v1552_v55 = vpop.eup %1551 }
 0x1b3   : > { %v1554_v56 = vpop.eup %1553  ;;  %v824_v58 = vadd.f32 1.0, %v1552_v55  ;;  %v788_v59 = vmul.f32 0.5, %v747_v53  ;;  %1329 = vmatprep.mubr.bf16.mxu1 %v875_v54 }
 0x1b4   : > { %v1556_v61 = vpop.eup %1555  ;;  %v863_v3 = vmul.f32 %v1554_v56, %v843_v57 }
 0x1b5   : > { %v844_v62 = vmul.f32 0.5, %v824_v58  ;;  %1567 = vtanh.f32 %v788_v59 }
 0x1b6   : > { %v1558_v1 = vpop.eup %1557  ;;  %1569 = vtanh.f32 %v741_v60 }
 0x1b7   : > { %v825_v2 = vadd.f32 1.0, %v1558_v1  ;;  %v864_v4 = vmul.f32 %v1556_v61, %v844_v62  ;;  %1571 = vtanh.f32 %v745_v63 }
 0x1b9   : > { %v876_v0 = vpack.c.bf16 %v864_v4, %v863_v3  ;;  %v845_v8 = vmul.f32 0.5, %v825_v2 }
 0x1ba   : > { %v1560_v5 = vpop.eup %1559 }
 0x1bb   : > { %v1562_v7 = vpop.eup %1561  ;;  %v826_v9 = vadd.f32 1.0, %v1560_v5  ;;  %1330 = vmatmul.mubr.bf16.gmra.mxu1 %v876_v0 }
 0x1bc   : > { %v1564_v10 = vpop.eup %1563  ;;  %v865_v14 = vmul.f32 %v1562_v7, %v845_v8 }
 0x1bd   : > { %v846_v11 = vmul.f32 0.5, %v826_v9 }
 0x1be   : > { %v1566_v12 = vpop.eup %1565 }
 0x1bf   : > { %v827_v13 = vadd.f32 1.0, %v1566_v12  ;;  %v866_v15 = vmul.f32 %v1564_v10, %v846_v11 }
 0x1c1   : > { %v877_v6 = vpack.c.bf16 %v866_v15, %v865_v14  ;;  %v847_v17 = vmul.f32 0.5, %v827_v13 }
 0x1c2   : > { %v1568_v16 = vpop.eup %1567 }
 0x1c3   : > { %v828_v18 = vadd.f32 1.0, %v1568_v16  ;;  %1333 = vmatprep.mubr.bf16.mxu1 %v877_v6  ;;  %v1570_v19 = vpop.eup %1569 }
 0x1c4   : > { %v1572_v21 = vpop.eup %1571  ;;  %v867_v22 = vmul.f32 %v1570_v19, %v847_v17 }
 0x1c5   : > { %v848_v20 = vmul.f32 0.5, %v828_v18 }
 0x1c7   : > { %v868_v23 = vmul.f32 %v1572_v21, %v848_v20 }
 0x1c9   : > { %v878_v24 = vpack.c.bf16 %v868_v23, %v867_v22 }
 0x1cb   : > { %1334 = vmatmul.mubr.bf16.gmra.mxu1 %v878_v24 }
 0x24b   : > { %v1319_v26 = vpop.f32.mrf.mxu1 }
 0x24c   : > { %v993_v27 = vadd.f32 %v1319_v26, %v1262_v25 }
 0x24d   : > { %v984_v28 = vpop.f32.mrf.mxu1 }
 0x24e   : > { %1065 = vst [vmem:[%s1990_s23 + $0x10] sm:$0xff] %v993_v27  ;;  %v985_v29 = vadd.f32 %v1262_v25, %v984_v28 }
 0x24f   : > { %v1320_v30 = vpop.f32.mrf.mxu1 }
 0x250   : > { %1063 = vst [vmem:[%s1990_s23] sm:$0xff] %v985_v29  ;;  %v996_v31 = vadd.f32 %v1320_v30, %v1262_v25 }
 0x251   : > { %v987_v32 = vpop.f32.mrf.mxu1 }
 0x252   : > { %1066 = vst [vmem:[%s1990_s23 + $0x18] sm:$0xff] %v996_v31  ;;  %v988_v33 = vadd.f32 %v1262_v25, %v987_v32 }
 0x254   : > { %1064 = vst [vmem:[%s1990_s23 + $0x8] sm:$0xff] %v988_v33 }
 0x25b   : > { %v1323_v34 = vpop.f32.mrf.mxu1 }
 0x25c   : > { %v1009_v35 = vadd.f32 %v1323_v34, %v1262_v25 }
 0x25d   : > { %v1000_v36 = vpop.f32.mrf.mxu1 }
 0x25e   : > { %1069 = vst [vmem:[%s1990_s23 + $0x30] sm:$0xff] %v1009_v35  ;;  %v1001_v37 = vadd.f32 %v1262_v25, %v1000_v36 }
 0x25f   : > { %v1324_v38 = vpop.f32.mrf.mxu1 }
 0x260   : > { %1067 = vst [vmem:[%s1990_s23 + $0x20] sm:$0xff] %v1001_v37  ;;  %v1012_v39 = vadd.f32 %v1324_v38, %v1262_v25 }
 0x261   : > { %v1003_v40 = vpop.f32.mrf.mxu1 }
 0x262   : > { %1070 = vst [vmem:[%s1990_s23 + $0x38] sm:$0xff] %v1012_v39  ;;  %v1004_v41 = vadd.f32 %v1262_v25, %v1003_v40 }
 0x264   : > { %1068 = vst [vmem:[%s1990_s23 + $0x28] sm:$0xff] %v1004_v41 }
 0x26b   : > { %v1327_v42 = vpop.f32.mrf.mxu1 }
 0x26c   : > { %v1025_v43 = vadd.f32 %v1327_v42, %v1262_v25 }
 0x26d   : > { %v1016_v44 = vpop.f32.mrf.mxu1 }
 0x26e   : > { %1073 = vst [vmem:[%s1990_s23 + $0x50] sm:$0xff] %v1025_v43  ;;  %v1017_v45 = vadd.f32 %v1262_v25, %v1016_v44 }
 0x26f   : > { %v1328_v46 = vpop.f32.mrf.mxu1 }
 0x270   : > { %1071 = vst [vmem:[%s1990_s23 + $0x40] sm:$0xff] %v1017_v45  ;;  %v1028_v47 = vadd.f32 %v1328_v46, %v1262_v25 }
 0x271   : > { %v1019_v48 = vpop.f32.mrf.mxu1 }
 0x272   : > { %1074 = vst [vmem:[%s1990_s23 + $0x58] sm:$0xff] %v1028_v47  ;;  %v1020_v49 = vadd.f32 %v1262_v25, %v1019_v48 }
 0x274   : > { %1072 = vst [vmem:[%s1990_s23 + $0x48] sm:$0xff] %v1020_v49 }
 0x27b   : > { %v1331_v50 = vpop.f32.mrf.mxu1 }
 0x27c   : > { %v1041_v51 = vadd.f32 %v1331_v50, %v1262_v25 }
 0x27d   : > { %v1032_v52 = vpop.f32.mrf.mxu1 }
 0x27e   : > { %1077 = vst [vmem:[%s1990_s23 + $0x70] sm:$0xff] %v1041_v51  ;;  %v1033_v53 = vadd.f32 %v1262_v25, %v1032_v52 }
 0x27f   : > { %v1332_v54 = vpop.f32.mrf.mxu1 }
 0x280   : > { %1075 = vst [vmem:[%s1990_s23 + $0x60] sm:$0xff] %v1033_v53  ;;  %v1044_v55 = vadd.f32 %v1332_v54, %v1262_v25 }
 0x281   : > { %v1035_v56 = vpop.f32.mrf.mxu1 }
 0x282   : > { %1078 = vst [vmem:[%s1990_s23 + $0x78] sm:$0xff] %v1044_v55  ;;  %v1036_v57 = vadd.f32 %v1262_v25, %v1035_v56 }
 0x284   : > { %1076 = vst [vmem:[%s1990_s23 + $0x68] sm:$0xff] %v1036_v57 }
 0x28b   : > { %v1335_v58 = vpop.f32.mrf.mxu1 }
 0x28c   : > { %v1057_v59 = vadd.f32 %v1335_v58, %v1262_v25 }
 0x28d   : > { %v1048_v60 = vpop.f32.mrf.mxu1 }
 0x28e   : > { %1081 = vst [vmem:[%s1990_s23 + $0x90] sm:$0xff] %v1057_v59  ;;  %v1049_v61 = vadd.f32 %v1262_v25, %v1048_v60 }
 0x28f   : > { %v1336_v62 = vpop.f32.mrf.mxu1 }
 0x290   : > { %1079 = vst [vmem:[%s1990_s23 + $0x80] sm:$0xff] %v1049_v61  ;;  %v1060_v63 = vadd.f32 %v1336_v62, %v1262_v25  ;;  %1090 = sbr.rel (!%p2091_p10) target bundleno = 688 (0x2b0), region = 56 }
 0x291   : > { %v1051_v1 = vpop.f32.mrf.mxu1 }
 0x292   : > { %1082 = vst [vmem:[%s1990_s23 + $0x98] sm:$0xff] %v1060_v63  ;;  %v1052_v2 = vadd.f32 %v1262_v25, %v1051_v1 }
 0x294   : > { %1080 = vst [vmem:[%s1990_s23 + $0x88] sm:$0xff] %v1052_v2 }
 0x295   : > { %s2100_s28 = smov (!%p1093_p1, %s1092_s28), 20 }
 0x296   : > { %s2016_s25 = sshll.u32 %s2100_s28, 7 }
 0x297   : > { %s1097_s26 = ssub.s32 2560, %s2016_s25 }
 0x298   : > { %1098 = vsyncadd %s1084_s8, %s1097_s26  ;;  %p1272_p3 = scmp.ne.s32.totalorder %s2016_s25, 0  ;;  %s1281_s30 = smul.u32 2560, %s1784_s22 }
 0x299   : > { %s1103_s11 = sshll.u32 %s1990_s23, 4  ;;  %s1730_s29 = smov [#allocation8]   ;;  %s2029_s11 = int_to_ptr.vmem [resolvable:$true] %s1103_s11 }
 0x29a   : > { %s2027_s15 = scalar_lea.hbm %s2079_s5, %s1281_s30  ;;  %s1651_s12 = scalar_lea.vmem %s2029_s11, %s2016_s25 }
 0x29b   : > { %p1652_p7 = scmp.ne.s32.totalorder %s2029_s11, %s1651_s12  ;;  %s1655_s7 = sshll.u32 %s1730_s29, 4  ;;  %s1656_s7 = int_to_ptr.vmem [resolvable:$false] %s1655_s7 }
 0x29c   : > { %s1657_s22 = scalar_lea.vmem %s1656_s7, 5120  ;;  %p1658_p4 = scmp.lt.s32.totalorder %s2029_s11, %s1656_s7 }
 0x29d   : > { %p1653_p9 = pnand %p1652_p7, %p1272_p3  ;;  %p1659_p6 = scmp.lt.s32.totalorder %s1657_s22, %s1651_s12 }
 0x29f   : > { %p1654_p12 = pneg %p1653_p9  ;;  %p1660_p11 = por %p1659_p6, %p1658_p4 }
 0x2a1   : > { %p1661_p0 = pnand %p1660_p11, %p1654_p12 }
 0x2a3   : > { %1664 = shalt.err (!%p1661_p0)
}
 0x2a4   : > { %s1665_s10 = scalar_lea.hbm %s2027_s15, %s2016_s25  ;;  %s1669_s17 = scalar_lea.hbm %s2079_s5, 4864 }
 0x2a5   : > { %p1666_p2 = scmp.ne.s32.totalorder %s2027_s15, %s1665_s10  ;;  %p1670_p10 = scmp.lt.s32.totalorder %s2027_s15, %s2079_s5 }
 0x2a6   : > { %p1671_p1 = scmp.lt.s32.totalorder %s1669_s17, %s1665_s10 }
 0x2a7   : > { %p1667_p5 = pnand %p1666_p2, %p1272_p3 }
 0x2a8   : > { %p1672_p7 = por %p1671_p1, %p1670_p10 }
 0x2a9   : > { %p1668_p13 = pneg %p1667_p5 }
 0x2ab   : > { %p1673_p9 = pnand %p1672_p7, %p1668_p13 }
 0x2ad   : > { %1676 = shalt.err (!%p1673_p9)
}
 0x2ae   : > { %s1731_s30 = smov 128   ;;  %s1732_s9 = smov 8  }
 0x2af   : > { %1109 = dma.vmem_to_hbm [thread:$0]  (%p1272_p3), %s2029_s11, %s2016_s25, %s2027_s15, %s1084_s8, %s1731_s30, %s1731_s30, %s1732_s9  }
 0x2b0 PF: > { %s1118_s14 = sand.u32 1, %s1707_s18   ;;  %p2092_p12 = scmp.ne.s32.totalorder %s2085_s6, 0 }
 0x2b1   : > { %s1119_s12 = scalar_lea.sflag [#allocation4], %s1118_s14 }
 0x2b2   : > { %p1357_p4 = pnand %p1199_p8, %p2092_p12 }
 0x2b4   : > { %p1358_p6 = pneg %p1357_p4 }
 0x2b6   : > { %1702 = dma.done.wait (%p1358_p6), %s1119_s12, 2560  }
 0x2b7   : > { %1704 = vsyncadd (%p1358_p6), %s1119_s12, 4294964736  ;;  %p19_p11 = scmp.ge.s32.totalorder %s1788_s24, 4   ;;  %s2093_s18 = smov %s1711_s19 }
 0x2b8   : > { %s2094_s19 = smov %s1715_s20  ;;  %s2095_s20 = smov %s1800_s27 }
 0x2b9   : > { %s2096_s21 = smov %s1788_s24  ;;  %21 = sbr.rel (!%p19_p11) target bundleno = 6 (0x6), region = 93 }
 0x2be   :  { %1124 = vsyncpa [#allocation3], 1 }
 0x2bf   :  { %1126 = vsyncpa [#allocation3 + $0x1], 1 }
 0x2c0   :  { %1127 = vsyncpa [#allocation6], 1 }
 0x2c1   :  { %1128 = vsyncpa [#allocation4], 1 }
 0x2c2   :  { %1130 = vsyncpa [#allocation4 + $0x1], 1 }

</bundles_post_ra>
